<compile_context>
chip_gen: v7x
topology: tpu7x:2x2x1
jax: 0.10.0
libtpu: 0.0.40
codegen_flags: <defaults>
</compile_context>

<pallas_src>
import functools

import jax
import jax.numpy as jnp
from jax.experimental import pallas as pl
from jax.experimental.pallas import tpu as pltpu


def _round_up(n, m):
    return ((n + m - 1) // m) * m


def _choose_block_b(batch, block_b):
    """Multiple of 8, <= block_b, and small enough to give >= 2 grid steps when possible."""
    b8 = _round_up(max(batch, 1), 8)
    cap = max(8, _round_up(b8, 16) // 2)   # multiple of 8; 2*cap >= b8  -> grid >= 2 (for b8 > 8)
    return min(block_b, b8, cap)


def vnet_kernel(x_ref, heads_ref, w1_ref, b1_ref, w2_ref, b2_ref, out_ref,
                *, nc, out_pad, out_dim):
    # share layer: h = relu(x @ W1t + b1);  W1t is pre-transposed (IN, H1) -> plain
    # last-dim x first-dim contraction, no in-kernel weight transpose.
    h = jax.lax.dot_general(x_ref[...], w1_ref[...], (((1,), (0,)), ((), ())),
                            preferred_element_type=jnp.float32)          # (BLOCK_B, H1) f32
    h = jnp.maximum(h + b1_ref[...], 0.0)
    h = h.astype(w2_ref.dtype)            # MXU input dtype only; epilogue stays f32

    heads = heads_ref[...]                # (BLOCK_B, 1) int32 per-sample head id
    acc = jnp.zeros((h.shape[0], out_dim), jnp.float32)

    for k in range(nc):                   # tiny static loop over heads
        # 128-lane-aligned static ref slice of the resident transposed head weights.
        w2_k = w2_ref[:, k * out_pad:(k + 1) * out_pad]                   # (H2, OUT_PAD)
        logits_k = jax.lax.dot_general(h, w2_k, (((1,), (0,)), ((), ())),
                                       preferred_element_type=jnp.float32)  # (BLOCK_B, OUT_PAD)
        # selection BEFORE the sigmoid, b2 folded into the masked sum; only OUT lanes kept.
        val_k = logits_k[:, :out_dim] + b2_ref[:, k * out_pad:k * out_pad + out_dim]
        acc = acc + jnp.where(heads == k, val_k, 0.0)

    # one sigmoid over the OUT useful lanes only; compact (BLOCK_B, OUT) store.
    out_ref[...] = jax.nn.sigmoid(acc).astype(out_ref.dtype)


def prepare_params(params, *, mxu_dtype=jnp.float32):
    """One-time weight prep (pad / transpose / cast) hoisted out of the per-call path."""
    w1, b1, w2, b2 = params["w1"], params["b1"], params["w2"], params["b2"]
    H1, IN = w1.shape
    NC, OUT, H2 = w2.shape
    assert H1 == H2, "share output dim must equal task input dim (hidden1 == hidden2)"

    OUT_PAD = _round_up(OUT, 128)
    # W2t[:, k*OUT_PAD + o] = w2[k, o, :]  -> one resident (H2, NC*OUT_PAD) matrix.
    w2_pad = jnp.zeros((NC, OUT_PAD, H2), w2.dtype).at[:, :OUT, :].set(w2)
    w2_t = jnp.transpose(w2_pad, (2, 0, 1)).reshape(H2, NC * OUT_PAD).astype(mxu_dtype)
    b2_p = (jnp.zeros((NC, OUT_PAD), jnp.float32).at[:, :OUT].set(b2.astype(jnp.float32))
            .reshape(1, NC * OUT_PAD))

    return {
        "w1_t": w1.T.astype(mxu_dtype),            # (IN, H1)
        "b1_r": b1.reshape(1, H1).astype(jnp.float32),
        "w2_t": w2_t,                              # (H2, NC*OUT_PAD)
        "b2_p": b2_p,                              # (1, NC*OUT_PAD)
        "nc": NC, "out": OUT, "out_pad": OUT_PAD,
    }


def vnet_forward(x, num, c, prepped, *, block_b=512):
    """x: (B, IN) float32, num: (B,) int32, c: (NC,) int32 -> (B, OUT) float32."""
    w1_t, b1_r = prepped["w1_t"], prepped["b1_r"]
    w2_t, b2_p = prepped["w2_t"], prepped["b2_p"]
    nc, out_dim, out_pad = prepped["nc"], prepped["out"], prepped["out_pad"]
    mxu_dtype = w1_t.dtype

    B, IN = x.shape
    H1 = w1_t.shape[1]

    BLOCK_B = _choose_block_b(B, block_b)
    B_pad = _round_up(B, BLOCK_B)

    heads = jnp.clip(c[num].astype(jnp.int32), 0, nc - 1).reshape(B, 1)
    if B_pad != B:
        # only pad (extra read/write of x) when the batch is not block-divisible
        x_in = jnp.zeros((B_pad, IN), mxu_dtype).at[:B].set(x.astype(mxu_dtype))
        heads_in = jnp.zeros((B_pad, 1), jnp.int32).at[:B].set(heads)
    else:
        x_in = x.astype(mxu_dtype)
        heads_in = heads

    grid = (B_pad // BLOCK_B,)
    kernel = functools.partial(vnet_kernel, nc=nc, out_pad=out_pad, out_dim=out_dim)

    out = pl.pallas_call(
        kernel,
        out_shape=jax.ShapeDtypeStruct((B_pad, out_dim), jnp.float32),
        grid=grid,
        in_specs=[
            pl.BlockSpec((BLOCK_B, IN), lambda i: (i, 0)),          # x block
            pl.BlockSpec((BLOCK_B, 1), lambda i: (i, 0)),           # per-sample head ids
            pl.BlockSpec((IN, H1), lambda i: (0, 0)),               # W1^T (resident)
            pl.BlockSpec((1, H1), lambda i: (0, 0)),                # b1 (resident)
            pl.BlockSpec((H1, nc * out_pad), lambda i: (0, 0)),     # all heads' W2^T (resident)
            pl.BlockSpec((1, nc * out_pad), lambda i: (0, 0)),      # all heads' b2 (resident)
        ],
        out_specs=pl.BlockSpec((BLOCK_B, out_dim), lambda i: (i, 0)),  # compact (no 128-lane padding)
        compiler_params=pltpu.CompilerParams(dimension_semantics=("parallel",)),
    )(x_in, heads_in, w1_t, b1_r, w2_t, b2_p)

    return out if B_pad == B else out[:B]
    # TODO(synk): if NC*OUT_PAD*H2 ever outgrows VMEM, switch to the MoE-style grouped pattern
    # (sort samples by head, scalar-prefetch group offsets, one W2 DMA per group).


def vnet_ref(x, num, c, params):
    """Pure-JAX reference of the PyTorch forward."""
    h = jnp.maximum(x @ params["w1"].T + params["b1"], 0.0)
    heads = c[num]
    w2 = params["w2"][heads]                       # (B, OUT, H2)
    b2 = params["b2"][heads]                       # (B, OUT)
    logits = jnp.einsum("bh,boh->bo", h, w2) + b2
    return jax.nn.sigmoid(logits)


def init_params(key, in_dim, hidden1, hidden2, out_dim, num_classes):
    """Deterministic init mimicking nn.Linear's U(-1/sqrt(fan_in), 1/sqrt(fan_in))."""
    k1, k2, k3, k4 = jax.random.split(key, 4)
    lim1 = 1.0 / jnp.sqrt(in_dim)
    lim2 = 1.0 / jnp.sqrt(hidden2)
    return {
        "w1": jax.random.uniform(k1, (hidden1, in_dim), jnp.float32, -lim1, lim1),
        "b1": jax.random.uniform(k2, (hidden1,), jnp.float32, -lim1, lim1),
        # stacked per-class heads: (num_classes, out_dim, hidden2)
        "w2": jax.random.uniform(k3, (num_classes, out_dim, hidden2), jnp.float32, -lim2, lim2),
        "b2": jax.random.uniform(k4, (num_classes, out_dim), jnp.float32, -lim2, lim2),
    }


if __name__ == "__main__":
    B, IN, H1, H2, OUT, NC = 24, 32, 32, 32, 8, 4   # B=24 -> BLOCK_B=16, grid=2, exercises padding

    key = jax.random.PRNGKey(0)
    kp, kx, kn, kc = jax.random.split(key, 4)

    params = init_params(kp, IN, H1, H2, OUT, NC)
    x = jax.random.normal(kx, (B, IN), jnp.float32)
    num = jax.random.randint(kn, (B,), 0, NC, jnp.int32)                  # sample meta-label
    c = jax.random.permutation(kc, jnp.arange(NC, dtype=jnp.int32))       # label -> head mapping

    ref = vnet_ref(x, num, c, params)

    # f32 MXU path: numerically tight vs. the f32 reference.
    prepped_f32 = prepare_params(params, mxu_dtype=jnp.float32)
    out_f32 = jax.block_until_ready(vnet_forward(x, num, c, prepped_f32))
    assert out_f32.shape == (B, OUT)
    assert jnp.allclose(out_f32, ref, atol=1e-5, rtol=1e-5), "f32 path mismatch vs reference"

    # bf16 MXU-input path (recommended default on v6e/v7x); epilogue stays f32 -> loose tolerance.
    prepped_bf16 = prepare_params(params, mxu_dtype=jnp.bfloat16)
    out_bf16 = jax.block_until_ready(vnet_forward(x, num, c, prepped_bf16))
    assert out_bf16.shape == (B, OUT)
    assert jnp.allclose(out_bf16, ref, atol=2e-2, rtol=0), "bf16 path mismatch vs reference"

    print("KERNEL_OK")
</pallas_src>

<mosaic_0001>
module attributes {stable_mosaic.version = 11 : i64} {
  func.func @vnet_kernel(%arg0: i32, %arg1: memref<16x32xf32, #tpu.memory_space<vmem>>, %arg2: memref<16x1xi32, #tpu.memory_space<vmem>>, %arg3: memref<32x32xf32, #tpu.memory_space<vmem>>, %arg4: memref<1x32xf32, #tpu.memory_space<vmem>>, %arg5: memref<32x512xf32, #tpu.memory_space<vmem>>, %arg6: memref<1x512xf32, #tpu.memory_space<vmem>>, %arg7: memref<16x8xf32, #tpu.memory_space<vmem>>) attributes {dimension_semantics = [#tpu.dimension_semantics<parallel>], iteration_bounds = array<i64: 2>, scalar_prefetch = 0 : i64, scratch_operands = 0 : i64, tpu.core_type = #tpu.core_type<tc>, window_params = [{transform_indices = @transform_0, window_bounds = array<i64: 16, 32>}, {transform_indices = @transform_1, window_bounds = array<i64: 16, 1>}, {pipeline_mode = #tpu.pipeline_mode<synchronous>, transform_indices = @transform_2, window_bounds = array<i64: 32, 32>}, {pipeline_mode = #tpu.pipeline_mode<synchronous>, transform_indices = @transform_3, window_bounds = array<i64: 1, 32>}, {pipeline_mode = #tpu.pipeline_mode<synchronous>, transform_indices = @transform_4, window_bounds = array<i64: 32, 512>}, {pipeline_mode = #tpu.pipeline_mode<synchronous>, transform_indices = @transform_5, window_bounds = array<i64: 1, 512>}, {transform_indices = @transform_6, window_bounds = array<i64: 16, 8>}]} {
    %c0 = arith.constant 0 : index
    %c0_0 = arith.constant 0 : index
    %0 = vector.load %arg1[%c0, %c0_0] : memref<16x32xf32, #tpu.memory_space<vmem>>, vector<16x32xf32>
    %c0_1 = arith.constant 0 : index
    %c0_2 = arith.constant 0 : index
    %1 = vector.load %arg3[%c0_1, %c0_2] : memref<32x32xf32, #tpu.memory_space<vmem>>, vector<32x32xf32>
    %cst = arith.constant dense<0.000000e+00> : vector<16x32xf32>
    %2 = tpu.matmul %0, %1, %cst {dimension_numbers = #tpu.dot_dimension_numbers<[1], [0], [0], [1], [0, 0, 1, 1], [], []>} : vector<16x32xf32>, vector<32x32xf32>, vector<16x32xf32> -> vector<16x32xf32>
    %c0_3 = arith.constant 0 : index
    %c0_4 = arith.constant 0 : index
    %3 = vector.load %arg4[%c0_3, %c0_4] : memref<1x32xf32, #tpu.memory_space<vmem>>, vector<1x32xf32>
    %4 = vector.broadcast %3 : vector<1x32xf32> to vector<16x32xf32>
    %5 = arith.addf %2, %4 : vector<16x32xf32>
    %cst_5 = arith.constant 0.000000e+00 : f32
    %6 = vector.broadcast %cst_5 : f32 to vector<16x32xf32>
    %7 = arith.maximumf %5, %6 : vector<16x32xf32>
    %c0_6 = arith.constant 0 : index
    %c0_7 = arith.constant 0 : index
    %8 = vector.load %arg2[%c0_6, %c0_7] : memref<16x1xi32, #tpu.memory_space<vmem>>, vector<16x1xi32>
    %cst_8 = arith.constant 0.000000e+00 : f32
    %9 = vector.broadcast %cst_8 : f32 to vector<16x8xf32>
    %c0_9 = arith.constant 0 : index
    %c0_10 = arith.constant 0 : index
    %10 = vector.load %arg5[%c0_9, %c0_10] : memref<32x512xf32, #tpu.memory_space<vmem>>, vector<32x128xf32>
    %cst_11 = arith.constant dense<0.000000e+00> : vector<16x128xf32>
    %11 = tpu.matmul %7, %10, %cst_11 {dimension_numbers = #tpu.dot_dimension_numbers<[1], [0], [0], [1], [0, 0, 1, 1], [], []>} : vector<16x32xf32>, vector<32x128xf32>, vector<16x128xf32> -> vector<16x128xf32>
    %12 = vector.extract_strided_slice %11 {offsets = [0, 0], sizes = [16, 8], strides = [1, 1]} : vector<16x128xf32> to vector<16x8xf32>
    %c0_12 = arith.constant 0 : index
    %c0_13 = arith.constant 0 : index
    %13 = vector.load %arg6[%c0_12, %c0_13] : memref<1x512xf32, #tpu.memory_space<vmem>>, vector<1x8xf32>
    %14 = vector.broadcast %13 : vector<1x8xf32> to vector<16x8xf32>
    %15 = arith.addf %12, %14 : vector<16x8xf32>
    %c0_i32 = arith.constant 0 : i32
    %16 = vector.broadcast %c0_i32 : i32 to vector<16x1xi32>
    %17 = arith.cmpi eq, %8, %16 : vector<16x1xi32>
    %cst_14 = arith.constant 0.000000e+00 : f32
    %18 = vector.shape_cast %17 : vector<16x1xi1> to vector<16x1xi1>
    %19 = vector.broadcast %18 : vector<16x1xi1> to vector<16x8xi1>
    %20 = vector.broadcast %cst_14 : f32 to vector<16x8xf32>
    %21 = arith.select %19, %15, %20 : vector<16x8xi1>, vector<16x8xf32>
    %22 = arith.addf %9, %21 : vector<16x8xf32>
    %c0_15 = arith.constant 0 : index
    %c128 = arith.constant 128 : index
    %23 = vector.load %arg5[%c0_15, %c128] : memref<32x512xf32, #tpu.memory_space<vmem>>, vector<32x128xf32>
    %cst_16 = arith.constant dense<0.000000e+00> : vector<16x128xf32>
    %24 = tpu.matmul %7, %23, %cst_16 {dimension_numbers = #tpu.dot_dimension_numbers<[1], [0], [0], [1], [0, 0, 1, 1], [], []>} : vector<16x32xf32>, vector<32x128xf32>, vector<16x128xf32> -> vector<16x128xf32>
    %25 = vector.extract_strided_slice %24 {offsets = [0, 0], sizes = [16, 8], strides = [1, 1]} : vector<16x128xf32> to vector<16x8xf32>
    %c0_17 = arith.constant 0 : index
    %c128_18 = arith.constant 128 : index
    %26 = vector.load %arg6[%c0_17, %c128_18] : memref<1x512xf32, #tpu.memory_space<vmem>>, vector<1x8xf32>
    %27 = vector.broadcast %26 : vector<1x8xf32> to vector<16x8xf32>
    %28 = arith.addf %25, %27 : vector<16x8xf32>
    %c1_i32 = arith.constant 1 : i32
    %29 = vector.broadcast %c1_i32 : i32 to vector<16x1xi32>
    %30 = arith.cmpi eq, %8, %29 : vector<16x1xi32>
    %cst_19 = arith.constant 0.000000e+00 : f32
    %31 = vector.shape_cast %30 : vector<16x1xi1> to vector<16x1xi1>
    %32 = vector.broadcast %31 : vector<16x1xi1> to vector<16x8xi1>
    %33 = vector.broadcast %cst_19 : f32 to vector<16x8xf32>
    %34 = arith.select %32, %28, %33 : vector<16x8xi1>, vector<16x8xf32>
    %35 = arith.addf %22, %34 : vector<16x8xf32>
    %c0_20 = arith.constant 0 : index
    %c256 = arith.constant 256 : index
    %36 = vector.load %arg5[%c0_20, %c256] : memref<32x512xf32, #tpu.memory_space<vmem>>, vector<32x128xf32>
    %cst_21 = arith.constant dense<0.000000e+00> : vector<16x128xf32>
    %37 = tpu.matmul %7, %36, %cst_21 {dimension_numbers = #tpu.dot_dimension_numbers<[1], [0], [0], [1], [0, 0, 1, 1], [], []>} : vector<16x32xf32>, vector<32x128xf32>, vector<16x128xf32> -> vector<16x128xf32>
    %38 = vector.extract_strided_slice %37 {offsets = [0, 0], sizes = [16, 8], strides = [1, 1]} : vector<16x128xf32> to vector<16x8xf32>
    %c0_22 = arith.constant 0 : index
    %c256_23 = arith.constant 256 : index
    %39 = vector.load %arg6[%c0_22, %c256_23] : memref<1x512xf32, #tpu.memory_space<vmem>>, vector<1x8xf32>
    %40 = vector.broadcast %39 : vector<1x8xf32> to vector<16x8xf32>
    %41 = arith.addf %38, %40 : vector<16x8xf32>
    %c2_i32 = arith.constant 2 : i32
    %42 = vector.broadcast %c2_i32 : i32 to vector<16x1xi32>
    %43 = arith.cmpi eq, %8, %42 : vector<16x1xi32>
    %cst_24 = arith.constant 0.000000e+00 : f32
    %44 = vector.shape_cast %43 : vector<16x1xi1> to vector<16x1xi1>
    %45 = vector.broadcast %44 : vector<16x1xi1> to vector<16x8xi1>
    %46 = vector.broadcast %cst_24 : f32 to vector<16x8xf32>
    %47 = arith.select %45, %41, %46 : vector<16x8xi1>, vector<16x8xf32>
    %48 = arith.addf %35, %47 : vector<16x8xf32>
    %c0_25 = arith.constant 0 : index
    %c384 = arith.constant 384 : index
    %49 = vector.load %arg5[%c0_25, %c384] : memref<32x512xf32, #tpu.memory_space<vmem>>, vector<32x128xf32>
    %cst_26 = arith.constant dense<0.000000e+00> : vector<16x128xf32>
    %50 = tpu.matmul %7, %49, %cst_26 {dimension_numbers = #tpu.dot_dimension_numbers<[1], [0], [0], [1], [0, 0, 1, 1], [], []>} : vector<16x32xf32>, vector<32x128xf32>, vector<16x128xf32> -> vector<16x128xf32>
    %51 = vector.extract_strided_slice %50 {offsets = [0, 0], sizes = [16, 8], strides = [1, 1]} : vector<16x128xf32> to vector<16x8xf32>
    %c0_27 = arith.constant 0 : index
    %c384_28 = arith.constant 384 : index
    %52 = vector.load %arg6[%c0_27, %c384_28] : memref<1x512xf32, #tpu.memory_space<vmem>>, vector<1x8xf32>
    %53 = vector.broadcast %52 : vector<1x8xf32> to vector<16x8xf32>
    %54 = arith.addf %51, %53 : vector<16x8xf32>
    %c3_i32 = arith.constant 3 : i32
    %55 = vector.broadcast %c3_i32 : i32 to vector<16x1xi32>
    %56 = arith.cmpi eq, %8, %55 : vector<16x1xi32>
    %cst_29 = arith.constant 0.000000e+00 : f32
    %57 = vector.shape_cast %56 : vector<16x1xi1> to vector<16x1xi1>
    %58 = vector.broadcast %57 : vector<16x1xi1> to vector<16x8xi1>
    %59 = vector.broadcast %cst_29 : f32 to vector<16x8xf32>
    %60 = arith.select %58, %54, %59 : vector<16x8xi1>, vector<16x8xf32>
    %61 = arith.addf %48, %60 : vector<16x8xf32>
    %62 = arith.negf %61 : vector<16x8xf32>
    %63 = math.exp %62 : vector<16x8xf32>
    %cst_30 = arith.constant 1.000000e+00 : f32
    %64 = vector.broadcast %cst_30 : f32 to vector<16x8xf32>
    %65 = arith.addf %64, %63 : vector<16x8xf32>
    %66 = arith.divf %64, %65 : vector<16x8xf32>
    %c0_31 = arith.constant 0 : index
    %c0_32 = arith.constant 0 : index
    %67 = vector.load %arg7[%c0_31, %c0_32] : memref<16x8xf32, #tpu.memory_space<vmem>>, vector<16x8xf32>
    tpu.vector_store %arg7[%c0_31, %c0_32], %66 {strides = array<i32>} : memref<16x8xf32, #tpu.memory_space<vmem>>, vector<16x8xf32>,
    return
  }
  func.func @transform_0(%arg0: i32) -> (i32, i32) {
    %c0_i32 = arith.constant 0 : i32
    %c0_i32_0 = arith.constant 0 : i32
    return %arg0, %c0_i32 : i32, i32
  }
  func.func @transform_1(%arg0: i32) -> (i32, i32) {
    %c0_i32 = arith.constant 0 : i32
    %c0_i32_0 = arith.constant 0 : i32
    return %arg0, %c0_i32 : i32, i32
  }
  func.func @transform_2(%arg0: i32) -> (i32, i32) {
    %c0_i32 = arith.constant 0 : i32
    %c0_i32_0 = arith.constant 0 : i32
    %c0_i32_1 = arith.constant 0 : i32
    return %c0_i32, %c0_i32_0 : i32, i32
  }
  func.func @transform_3(%arg0: i32) -> (i32, i32) {
    %c0_i32 = arith.constant 0 : i32
    %c0_i32_0 = arith.constant 0 : i32
    %c0_i32_1 = arith.constant 0 : i32
    return %c0_i32, %c0_i32_0 : i32, i32
  }
  func.func @transform_4(%arg0: i32) -> (i32, i32) {
    %c0_i32 = arith.constant 0 : i32
    %c0_i32_0 = arith.constant 0 : i32
    %c0_i32_1 = arith.constant 0 : i32
    return %c0_i32, %c0_i32_0 : i32, i32
  }
  func.func @transform_5(%arg0: i32) -> (i32, i32) {
    %c0_i32 = arith.constant 0 : i32
    %c0_i32_0 = arith.constant 0 : i32
    %c0_i32_1 = arith.constant 0 : i32
    return %c0_i32, %c0_i32_0 : i32, i32
  }
  func.func @transform_6(%arg0: i32) -> (i32, i32) {
    %c0_i32 = arith.constant 0 : i32
    %c0_i32_0 = arith.constant 0 : i32
    return %arg0, %c0_i32 : i32, i32
  }
}

</mosaic_0001>

<bundles_post_ra>
// kernel: tpu_custom_call.1
= control target key start
LH: loop header
LB: loop body
LE: loop exit
PB: predicated region body
PF: predicated region fallthrough
CT: control target
= control target key end

     0   :  { %11 = vsyncpa [#allocation3], 0  ;;  %s1379_s0 = inlined_call_operand.vmem [shape: f32[32,32], index: 0, kind: input, shape index: {}]   ;;  %s1380_s1 = inlined_call_operand.vmem [shape: s32[32,1], index: 1, kind: input, shape index: {}]   ;;  %s1381_s2 = inlined_call_operand.hbm [shape: f32[32,32], index: 2, kind: input, shape index: {}]   ;;  %s1382_s3 = inlined_call_operand.vmem [shape: f32[1,32], index: 3, kind: input, shape index: {}]   ;;  %s1383_s4 = inlined_call_operand.hbm [shape: f32[32,512], index: 4, kind: input, shape index: {}]   ;;  %s1384_s5 = inlined_call_operand.vmem [shape: f32[1,512], index: 5, kind: input, shape index: {}]   ;;  %s1385_s6 = inlined_call_operand.vmem [shape: f32[32,8], index: 6, kind: output, shape index: {}]  }
   0x1   :  { %12 = vsyncpa [#allocation5], 0  ;;  %s1250_s21 = smov 0  }
   0x2 LB: > { %s1208_s22 = smov [#allocation2]   ;;  %s933_s24 = sadd.s32 4294967295, %s1206_s21   ;;  %s1206_s21 = sphi %s1250_s21, %s18_s21  }
   0x3   : > { %s197_s23 = sshll.u32 %s1208_s22, 4  ;;  %p935_p0 = scmp.ge.s32.totalorder %s1206_s21, 1  ;;  %s198_s23 = int_to_ptr.vmem [resolvable:$true] %s197_s23 }
   0x4   : > { %p185_p1 = scmp.lt.s32.totalorder %s1206_s21, 3  ;;  %p1264_p3 = scmp.eq.s32.totalorder %s933_s24, 0 }
   0x5   : > { %s1209_s27 = smov [#allocation4]   ;;  %s1136_s8 = scalar_lea.hbm %s1381_s2, 512 }
   0x6   : > { %p1258_p2 = pnand %p935_p0, %p185_p1  ;;  %s213_s28 = sshll.u32 %s1209_s27, 4  ;;  %s1276_s28 = int_to_ptr.vmem [resolvable:$true] %s213_s28 }
   0x7   : > { %s1390_s26 = scalar_select %p1264_p3, 1, 0 }
   0x8   : > { %s1389_s25 = scalar_select %p1258_p2, 1, 0 }
   0x9   : > { %p1100_p4 = pneg %p1258_p2  ;;  %p1137_p6 = scmp.ne.s32.totalorder %s1381_s2, %s1136_s8 }
   0xa   : > { %p1143_p10 = scmp.lt.u32.totalorder %s1136_s8, %s1381_s2 }
   0xb   : > { %p1272_p5 = pnand %p1264_p3, %p1100_p4 }
   0xd   : > { %p1138_p7 = pneg %p1272_p5 }
   0xf   : > { %p1139_p8 = pnand %p1138_p7, %p1137_p6 }
  0x11   : > { %p1140_p9 = pneg %p1139_p8 }
  0x13   : > { %p1145_p11 = pnand %p1143_p10, %p1140_p9 }
  0x15   : > { %1148 = shalt.err (!%p1145_p11)
}
  0x16   : > { %s1149_s13 = scalar_lea.vmem %s198_s23, 512  ;;  %p1157_p1 = scmp.lt.s32.totalorder %s198_s23, %s198_s23 }
  0x17   : > { %p1150_p12 = scmp.ne.s32.totalorder %s198_s23, %s1149_s13  ;;  %p1158_p4 = scmp.lt.s32.totalorder %s1149_s13, %s1149_s13 }
  0x19   : > { %p1152_p13 = pnand %p1150_p12, %p1138_p7  ;;  %p1159_p3 = por %p1158_p4, %p1157_p1 }
  0x1b   : > { %p1153_p0 = pneg %p1152_p13 }
  0x1d   : > { %p1160_p2 = pnand %p1159_p3, %p1153_p0 }
  0x1f   : > { %1163 = shalt.err (!%p1160_p2)
}
  0x20   : > { %s1210_s14 = smov 128   ;;  %s1211_s15 = smov 8  }
  0x21   : > { %1103 = dma.hbm_to_vmem [thread:$0]  (!%p1272_p5), %s1381_s2, 512, %s198_s23, [#allocation3], %s1210_s14, %s1210_s14, %s1211_s15  }
  0x22   : > { %s1164_s20 = scalar_lea.hbm %s1383_s4, 2048 }
  0x23   : > { %p1165_p6 = scmp.ne.s32.totalorder %s1383_s4, %s1164_s20  ;;  %p1171_p8 = scmp.lt.u32.totalorder %s1164_s20, %s1383_s4 }
  0x25   : > { %p1167_p2 = pnand %p1165_p6, %p1138_p7 }
  0x27   : > { %p1168_p3 = pneg %p1167_p2 }
  0x29   : > { %p1173_p9 = pnand %p1171_p8, %p1168_p3 }
  0x2b   : > { %1176 = shalt.err (!%p1173_p9)
}
  0x2c   : > { %s1177_s23 = scalar_lea.vmem %s1276_s28, 2048  ;;  %p1185_p13 = scmp.lt.s32.totalorder %s1276_s28, %s1276_s28 }
  0x2d   : > { %p1178_p10 = scmp.ne.s32.totalorder %s1276_s28, %s1177_s23  ;;  %p1186_p0 = scmp.lt.s32.totalorder %s1177_s23, %s1177_s23 }
  0x2f   : > { %p1180_p11 = pnand %p1178_p10, %p1138_p7  ;;  %p1187_p1 = por %p1186_p0, %p1185_p13 }
  0x31   : > { %p1181_p12 = pneg %p1180_p11 }
  0x33   : > { %p1188_p4 = pnand %p1187_p1, %p1181_p12 }
  0x35   : > { %1191 = shalt.err (!%p1188_p4)
}
  0x36   : > { %s1212_s8 = smov 512   ;;  %s1213_s9 = smov 32  }
  0x37   : > { %1106 = dma.hbm_to_vmem [thread:$0]  (!%p1272_p5), %s1383_s4, 2048, %s1276_s28, [#allocation5], %s1212_s8, %s1212_s8, %s1213_s9  }
  0x38   : > { %p1392_p6 = scmp.ne.s32.totalorder %s1389_s25, 0 }
  0x39   : > { %p1393_p7 = scmp.ne.s32.totalorder (!%p1392_p6), %s1390_s26, 0 }
  0x3a   : > { %250 = sbr.rel (%p1392_p6) target bundleno = 553 (0x229), region = 44 }
  0x41   : > { %1197 = dma.done.wait (%p1393_p7), [#allocation3], 512  }
  0x42   : > { %1199 = vsyncadd (%p1393_p7), [#allocation3], 4294966784 }
  0x43   : > { %1201 = dma.done.wait (%p1393_p7), [#allocation5], 2048  }
  0x44   : > { %1203 = vsyncadd (%p1393_p7), [#allocation5], 4294965248  ;;  %s942_s29 = sshll.u32 %s933_s24, 1  ;;  %vm320_vm0 = vcmask 261120   ;;  %v309_v0 = vld [vmem:[#allocation2] sm:$0xff]  ;;  %v310_v1 = vld [vmem:[#allocation2 + $0x8] sm:$0xff] }
  0x45   : > { %p290_p2 = scmp.lt.s32.totalorder %s942_s29, 3  ;;  %v311_v2 = vld [vmem:[#allocation2 + $0x10] sm:$0xff]  ;;  %v1052_v3 = vpack.c.bf16 %v310_v1, %v309_v0  ;;  %v312_v4 = vld [vmem:[#allocation2 + $0x18] sm:$0xff]  ;;  %v406_v7 = vld [vmem:[#allocation4] sm:$0xff]  ;;  %v1214_v28 = vmov 0  }
  0x46   : > { %v1056_v6 = vpack.c.bf16 %v312_v4, %v311_v2  ;;  %v407_v8 = vld [vmem:[#allocation4 + $0x20] sm:$0xff]  ;;  %v516_v9 = vld [vmem:[#allocation4 + $0x8] sm:$0xff]  ;;  %v620_v20 = vld [vmem:[#allocation4 + $0x10] sm:$0xff]  ;;  %1126 = vset.pattern.permute.xlu0 %v1214_v28  ;;  %1127 = vset.pattern.permute.xlu1 %v1214_v28 }
  0x47   : > { %s1395_s29 = smov (!%p290_p2, %s942_s29), 3  ;;  %1053 = vmatprep.subr.bf16.mxu0 %v1052_v3  ;;  %v1060_v10 = vpack.c.bf16 %v407_v8, %v406_v7  ;;  %v517_v11 = vld [vmem:[#allocation4 + $0x28] sm:$0xff]  ;;  %v408_v14 = vld [vmem:[#allocation4 + $0x40] sm:$0xff]  ;;  %v621_v21 = vld [vmem:[#allocation4 + $0x30] sm:$0xff] }
  0x48   : > { %s1337_s28 = sshll.u32 %s1395_s29, 3  ;;  %1055 = vmatpush3.bf16.msra.mxu0 %v1052_v3  ;;  %v1068_v12 = vpack.c.bf16 %v517_v11, %v516_v9  ;;  %v409_v15 = vld [vmem:[#allocation4 + $0x60] sm:$0xff]  ;;  %v518_v16 = vld [vmem:[#allocation4 + $0x48] sm:$0xff]  ;;  %v724_v22 = vld [vmem:[#allocation4 + $0x18] sm:$0xff]  ;;  %v1076_v23 = vpack.c.bf16 %v621_v21, %v620_v20 }
  0x49   : > { %s293_s13 = scalar_lea.vmem %s1379_s0, %s1337_s28  ;;  %1057 = vmatprep.subr.bf16.mxu0 %v1056_v6  ;;  %1061 = vmatprep.subr.bf16.mxu1 %v1060_v10  ;;  %v1064_v17 = vpack.c.bf16 %v409_v15, %v408_v14  ;;  %v519_v18 = vld [vmem:[#allocation4 + $0x68] sm:$0xff]  ;;  %v725_v24 = vld [vmem:[#allocation4 + $0x38] sm:$0xff]  ;;  %s299_s14 = scalar_lea.vmem %s1380_s1, %s1337_s28  ;;  %v948_v37 = vld [vmem:[%s1382_s3] ss:$0 sm:$0xff] }
  0x4a   : > { %v307_v5 = vld [vmem:[%s293_s13] sm:$0xff]  ;;  %1063 = vmatpush3.bf16.msra.mxu1 %v1060_v10  ;;  %v308_v13 = vld [vmem:[%s293_s13 + $0x8] sm:$0xff]  ;;  %v1072_v19 = vpack.c.bf16 %v519_v18, %v518_v16  ;;  %v1084_v25 = vpack.c.bf16 %v725_v24, %v724_v22  ;;  %v622_v42 = vld [vmem:[#allocation4 + $0x50] sm:$0xff]  ;;  %s305_s9 = scalar_lea.vmem %s1385_s6, %s1337_s28 }
  0x4b   : > { %1005 = vmatprep.mubr.msk.f32.mxu0 %vm320_vm0, %v307_v5  ;;  %1065 = vmatprep.subr.bf16.mxu1 %v1064_v17  ;;  %v404_v26 = vld [vmem:[%s299_s14] sm:$0xff]  ;;  %v405_v27 = vld [vmem:[%s299_s14 + $0x8] sm:$0xff]  ;;  %v623_v43 = vld [vmem:[#allocation4 + $0x70] sm:$0xff] }
  0x4c   : > { %1059 = vmatpush3.bf16.msra.mxu0 %v1056_v6  ;;  %vm500_vm1 = vcmp.eq.s32.totalorder %v404_v26, 0  ;;  %vm501_vm2 = vcmp.eq.s32.totalorder %v405_v27, 0  ;;  %vm604_vm3 = vcmp.eq.s32.totalorder %v404_v26, 1  ;;  %vm605_vm4 = vcmp.eq.s32.totalorder %v405_v27, 1  ;;  %v726_v44 = vld [vmem:[#allocation4 + $0x58] sm:$0xff] }
  0x4d   : > { %1069 = vmatprep.subr.bf16.mxu0 %v1068_v12  ;;  %v502_v29 = vsel %vm500_vm1, 1, %v1214_v28  ;;  %v503_v30 = vsel %vm501_vm2, 1, %v1214_v28  ;;  %v606_v31 = vsel %vm604_vm3, 1, %v1214_v28  ;;  %v607_v32 = vsel %vm605_vm4, 1, %v1214_v28  ;;  %v727_v45 = vld [vmem:[#allocation4 + $0x78] sm:$0xff] }
  0x4e   : > { %1067 = vmatpush3.bf16.msra.mxu1 %v1064_v17  ;;  %505 = vperm.xlu0 %1126, %v502_v29   ;;  %vm708_vm5 = vcmp.eq.s32.totalorder %v404_v26, 2  ;;  %vm709_vm6 = vcmp.eq.s32.totalorder %v405_v27, 2  ;;  %vm812_vm7 = vcmp.eq.s32.totalorder %v404_v26, 3  ;;  %vm813_vm8 = vcmp.eq.s32.totalorder %v405_v27, 3  ;;  %v953_v54 = vld [vmem:[%s1384_s5] ss:$0 sm:$0xff] }
  0x4f   : > { %1006 = vmatmul.mubr.msk.f32.vlgmr.msra.gmra.mrb[0].mxu0 %vm320_vm0, %v308_v13  ;;  %1077 = vmatprep.subr.bf16.mxu1 %v1076_v23  ;;  %v710_v33 = vsel %vm708_vm5, 1, %v1214_v28  ;;  %v711_v34 = vsel %vm709_vm6, 1, %v1214_v28  ;;  %v814_v35 = vsel %vm812_vm7, 1, %v1214_v28  ;;  %v815_v36 = vsel %vm813_vm8, 1, %v1214_v28  ;;  %v956_v55 = vld [vmem:[%s1384_s5 + $0x1] ss:$0 sm:$0xff] }
  0x50   : > { %1071 = vmatpush3.bf16.msra.mxu0 %v1068_v12  ;;  %508 = vperm.xlu1 %1127, %v503_v30   ;;  %v1080_v48 = vpack.c.bf16 %v623_v43, %v622_v42  ;;  %v1088_v49 = vpack.c.bf16 %v727_v45, %v726_v44  ;;  %v959_v8 = vld [vmem:[%s1384_s5 + $0x2] ss:$0 sm:$0xff]  ;;  %v962_v9 = vld [vmem:[%s1384_s5 + $0x3] ss:$0 sm:$0xff]  ;;  %vm840_vm1 = vcmask 64512  }
  0x51   : > { %1073 = vmatprep.subr.bf16.mxu0 %v1072_v19 }
  0x52   : > { %609 = vperm.xlu0 %1126, %v606_v31  }
  0x54   : > { %1075 = vmatpush3.bf16.msra.mxu0 %v1072_v19  ;;  %612 = vperm.xlu1 %1127, %v607_v32  }
  0x55   : > { %1085 = vmatprep.subr.bf16.mxu0 %v1084_v25 }
  0x56   : > { %713 = vperm.xlu0 %1126, %v710_v33  }
  0x58   : > { %716 = vperm.xlu1 %1127, %v711_v34  }
  0x5a   : > { %817 = vperm.xlu0 %1126, %v814_v35  }
  0x5c   : > { %820 = vperm.xlu1 %1127, %v815_v36  }
  0xcd   : > { %v506_v51 = vpop.permute.xlu0 %505 }
  0xce   : > { %vm510_vm11 = vcmp.eq.s32.totalorder %v506_v51, 1 }
  0xcf   : > { %v509_v50 = vpop.permute.xlu1 %508 }
  0xd0   : > { %vm511_vm9 = vcmp.eq.s32.totalorder %v509_v50, 1 }
  0xd1   : > { %v610_v53 = vpop.permute.xlu0 %609 }
  0xd2   : > { %vm614_vm12 = vcmp.eq.s32.totalorder %v610_v53, 1 }
  0xd3   : > { %v613_v52 = vpop.permute.xlu1 %612 }
  0xd4   : > { %vm615_vm10 = vcmp.eq.s32.totalorder %v613_v52, 1 }
  0xd5   : > { %v714_v3 = vpop.permute.xlu0 %713 }
  0xd6   : > { %vm718_vm14 = vcmp.eq.s32.totalorder %v714_v3, 1 }
  0xd7   : > { %v717_v56 = vpop.permute.xlu1 %716 }
  0xd8   : > { %vm719_vm13 = vcmp.eq.s32.totalorder %v717_v56, 1 }
  0xd9   : > { %v818_v17 = vpop.permute.xlu0 %817 }
  0xdb   : > { %v821_v10 = vpop.permute.xlu1 %820 }
  0xdc   : > { %vm823_vm15 = vcmp.eq.s32.totalorder %v821_v10, 1 }
 0x122   : > { %v1007_v38 = vpop.f32.mrb[0].mxu0 }
 0x123   : > { %v399_v39 = vadd.f32 %v1007_v38, %v948_v37  ;;  %v393_v40 = vpop.f32.mrb[1].mxu0 }
 0x124   : > { %v394_v41 = vadd.f32 %v948_v37, %v393_v40 }
 0x125   : > { %v403_v47 = vmax.f32 %v399_v39, 0.0 }
 0x126   : > { %v402_v46 = vmax.f32 %v394_v41, 0.0 }
 0x128   : > { %1016 = vmatprep.mubr.msk.f32.mxu1 %vm320_vm0, %v402_v46  ;;  %1027 = vmatprep.mubr.msk.f32.mxu0 %vm320_vm0, %v402_v46 }
 0x129   : > { %1017 = vmatmul.mubr.msk.f32.vlgmr.msra.gmra.mrb[0].mxu1 %vm320_vm0, %v403_v47  ;;  %1028 = vmatmul.mubr.msk.f32.vlgmr.msra.gmra.mrb[2].mxu0 %vm320_vm0, %v403_v47 }
 0x12a   : > { %1079 = vmatpush3.bf16.msra.mxu1 %v1076_v23  ;;  %1087 = vmatpush3.bf16.msra.mxu0 %v1084_v25 }
 0x12b   : > { %1038 = vmatprep.mubr.msk.f32.mxu1 %vm320_vm0, %v402_v46  ;;  %1049 = vmatprep.mubr.msk.f32.mxu0 %vm320_vm0, %v402_v46 }
 0x12c   : > { %1081 = vmatprep.subr.bf16.mxu1 %v1080_v48  ;;  %1089 = vmatprep.subr.bf16.mxu0 %v1088_v49 }
 0x12e   : > { %1083 = vmatpush3.bf16.msra.mxu1 %v1080_v48  ;;  %1091 = vmatpush3.bf16.msra.mxu0 %v1088_v49 }
 0x131   : > { %1039 = vmatmul.mubr.msk.f32.vlgmr.msra.gmra.mrb[2].mxu1 %vm320_vm0, %v403_v47  ;;  %1050 = vmatmul.mubr.msk.f32.vlgmr.msra.gmra.mrb[4].mxu0 %vm320_vm0, %v403_v47  ;;  %vm822_vm0 = vcmp.eq.s32.totalorder %v818_v17, 1 }
 0x1fc   : > { %v1018_v57 = vpop.f32.mrb[0].mxu1  ;;  %v1029_v58 = vpop.f32.mrb[2].mxu0 }
 0x1fd   : > { %v499_v59 = vadd.f32 %v1018_v57, %v953_v54  ;;  %v603_v60 = vadd.f32 %v1029_v58, %v956_v55  ;;  %v482_v61 = vpop.f32.mrb[1].mxu1  ;;  %v586_v62 = vpop.f32.mrb[3].mxu0 }
 0x1fe   : > { %v498_v63 = vadd.f32 %v953_v54, %v482_v61  ;;  %v602_v0 = vadd.f32 %v956_v55, %v586_v62 }
 0x1ff   : > { %v513_v1 = vsel %vm511_vm9, %v499_v59, 0.0  ;;  %v617_v2 = vsel %vm615_vm10, %v603_v60, 0.0 }
 0x200   : > { %v619_v4 = vadd.f32 %v617_v2, %v513_v1  ;;  %v512_v5 = vsel %vm510_vm11, %v498_v63, 0.0  ;;  %v616_v6 = vsel %vm614_vm12, %v602_v0, 0.0 }
 0x201   : > { %v618_v7 = vadd.f32 %v616_v6, %v512_v5 }
 0x204   : > { %v1040_v11 = vpop.f32.mrb[2].mxu1  ;;  %v1051_v12 = vpop.f32.mrb[4].mxu0 }
 0x205   : > { %v707_v13 = vadd.f32 %v1040_v11, %v959_v8  ;;  %v811_v14 = vadd.f32 %v1051_v12, %v962_v9  ;;  %v690_v15 = vpop.f32.mrb[3].mxu1  ;;  %v794_v16 = vpop.f32.mrb[5].mxu0 }
 0x206   : > { %v706_v18 = vadd.f32 %v959_v8, %v690_v15  ;;  %v810_v19 = vadd.f32 %v962_v9, %v794_v16 }
 0x207   : > { %v721_v20 = vsel %vm719_vm13, %v707_v13, 0.0  ;;  %v825_v23 = vsel %vm823_vm15, %v811_v14, 0.0 }
 0x208   : > { %v723_v21 = vadd.f32 %v721_v20, %v619_v4  ;;  %v720_v22 = vsel %vm718_vm14, %v706_v18, 0.0  ;;  %v824_v26 = vsel %vm822_vm0, %v810_v19, 0.0 }
 0x209   : > { %v722_v24 = vadd.f32 %v720_v22, %v618_v7 }
 0x20a   : > { %v827_v25 = vadd.f32 %v825_v23, %v723_v21 }
 0x20b   : > { %v826_v27 = vadd.f32 %v824_v26, %v722_v24 }
 0x20c   : > { %v964_v28 = vmul.f32 -1.442695, %v827_v25 }
 0x20d   : > { %v963_v29 = vmul.f32 -1.442695, %v826_v27 }
 0x20e   : > { %1128 = vpow2.f32 %v964_v28 }
 0x20f   : > { %1130 = vpow2.f32 %v963_v29 }
 0x218   : > { %v1129_v30 = vpop.eup %1128 }
 0x219   : > { %v1131_v31 = vpop.eup %1130  ;;  %v835_v32 = vadd.f32 1.0, %v1129_v30 }
 0x21a   : > { %v834_v33 = vadd.f32 1.0, %v1131_v31 }
 0x21c   : > { %1132 = vrcp.f32 %v834_v33 }
 0x21d   : > { %1134 = vrcp.f32 %v835_v32 }
 0x226   : > { %v1133_v34 = vpop.eup %1132 }
 0x227   : > { %v1135_v35 = vpop.eup %1134  ;;  %841 = vst.msk [vmem:[%s305_s9] sm:$0xff] %vm840_vm1, %v1133_v34 }
 0x228   : > { %842 = vst.msk [vmem:[%s305_s9 + $0x8] sm:$0xff] %vm840_vm1, %v1135_v35 }
 0x229 PF: > { %s18_s21 = sadd.s32 1, %s1206_s21  }
 0x22a   : > { %p15_p5 = scmp.ge.s32.totalorder %s18_s21, 4  }
 0x22c   :  { %17 = sbr.rel (!%p15_p5) target bundleno = 2 (0x2), region = 86 }
 0x233   :  { %865 = vsyncpa [#allocation3], 1 }
 0x234   :  { %867 = vsyncpa [#allocation3 + $0x1], 1 }
 0x235   :  { %868 = vsyncpa [#allocation5], 1 }

</bundles_post_ra>
